<compile_context>
chip_gen: v6e
topology: v6e:2x2x1
jax: 0.10.0
libtpu: 0.0.40
codegen_flags: <defaults>
</compile_context>

<pallas_src>
import jax
import jax.numpy as jnp
from jax.experimental import pallas as pl
from jax.experimental.pallas import tpu as pltpu


H2_PAD = 128  # layer-2 width (2 * 5) zero-padded to one full lane dimension


# ---------------------------------------------------------------------------
# Kernel
# ---------------------------------------------------------------------------
def _fused_mlp_kernel(mem_ref, w1_ref, b1_ref, w2_ref, b2_ref,
                      w3w_ref, b3w_ref, w3b_ref, b3b_ref,
                      out_w_ref, out_b_ref):
    """Fused dual-generator 3-layer MLP on one (TR, M) row tile.

    layer 1: (TR, M) bf16 @ (M, 64)   bf16 -> f32 (+bias, ReLU)  [concat gens]
    layer 2: (TR, 64) f32 @ (64, 128) f32  -> f32 (+bias, ReLU)  [block-diag,
                                                  zero-padded to 128 lanes]
    layer 3: two heads (128 -> d_w) and (128 -> d_b) writing the two outputs
             (weight-generator / bias-generator) directly.
    """
    x = mem_ref[...].astype(jnp.bfloat16)      # in-VMEM cast (free VPU pack)
    h1 = jnp.dot(x, w1_ref[...], preferred_element_type=jnp.float32)
    h1 = jnp.maximum(h1 + b1_ref[...], 0.0)
    h2 = jnp.dot(h1, w2_ref[...], preferred_element_type=jnp.float32)
    h2 = jnp.maximum(h2 + b2_ref[...], 0.0)
    yw = jnp.dot(h2, w3w_ref[...], preferred_element_type=jnp.float32) + b3w_ref[...]
    yb = jnp.dot(h2, w3b_ref[...], preferred_element_type=jnp.float32) + b3b_ref[...]
    # TODO(synk): if downstream tolerates bf16 generated params, emit bf16 here
    # (halves the dominant output HBM stream).
    out_w_ref[...] = yw.astype(out_w_ref.dtype)
    out_b_ref[...] = yb.astype(out_b_ref.dtype)


def _round_up(x, m):
    return ((x + m - 1) // m) * m


def _choose_row_tile(R, memory_size, d_w, d_b):
    """Row tile: multiple of 16, <=2048, >=2 grid steps when R allows (v7x
    megacore sharding), and capped so double-buffered in/out tiles stay well
    under v5e's 16 MiB default scoped VMEM."""
    bytes_per_row = 2 * 4 * (memory_size + d_w + d_b)   # double-buffered, f32
    vmem_cap = max(16, ((12 << 20) // bytes_per_row) // 16 * 16)
    cap = min(2048, vmem_cap)
    r16 = _round_up(max(R, 1), 16)
    half = _round_up((r16 + 1) // 2, 16)   # aim for >=2 grid steps
    return max(16, min(cap, half))


def _run_fused(mem2d, fused_params, d_w, d_b, tr):
    """mem2d: (R, M) in its native dtype. Returns ((R, d_w), (R, d_b)) f32."""
    w1, b1, w2, b2, w3w, b3w, w3b, b3b = fused_params
    r, m = mem2d.shape
    grid = (pl.cdiv(r, tr),)

    resident = lambda i: (0, 0)   # generator weights stay VMEM-resident

    h1w, h2w = w1.shape[1], w2.shape[1]
    flops = 2 * r * (m * h1w + h1w * h2w + h2w * (d_w + d_b))
    bytes_accessed = (
        int(mem2d.size) * mem2d.dtype.itemsize
        + r * (d_w + d_b) * 4
        + sum(int(p.size) * p.dtype.itemsize for p in fused_params))

    return pl.pallas_call(
        _fused_mlp_kernel,
        out_shape=(jax.ShapeDtypeStruct((r, d_w), jnp.float32),
                   jax.ShapeDtypeStruct((r, d_b), jnp.float32)),
        grid_spec=pltpu.PrefetchScalarGridSpec(
            num_scalar_prefetch=0,
            grid=grid,
            in_specs=[
                pl.BlockSpec((tr, m), lambda i: (i, 0)),   # memory rows (tiled)
                pl.BlockSpec(w1.shape, resident),
                pl.BlockSpec(b1.shape, resident),
                pl.BlockSpec(w2.shape, resident),
                pl.BlockSpec(b2.shape, resident),
                pl.BlockSpec(w3w.shape, resident),
                pl.BlockSpec(b3w.shape, resident),
                pl.BlockSpec(w3b.shape, resident),
                pl.BlockSpec(b3b.shape, resident),
            ],
            out_specs=(pl.BlockSpec((tr, d_w), lambda i: (i, 0)),
                       pl.BlockSpec((tr, d_b), lambda i: (i, 0))),
        ),
        compiler_params=pltpu.CompilerParams(
            dimension_semantics=("parallel",)),
        cost_estimate=pl.CostEstimate(
            flops=flops, transcendentals=0, bytes_accessed=bytes_accessed),
    )(mem2d, w1, b1, w2, b2, w3w, b3w, w3b, b3b)


# ---------------------------------------------------------------------------
# Parameter handling
# ---------------------------------------------------------------------------
def _init_linear(key, fan_in, fan_out):
    """Deterministic init mimicking torch.nn.Linear (uniform +/- 1/sqrt(fan_in))."""
    kw, kb = jax.random.split(key)
    bound = 1.0 / jnp.sqrt(jnp.asarray(fan_in, jnp.float32))
    # Stored as (in_features, out_features) — transpose of torch's (out, in).
    w = jax.random.uniform(kw, (fan_in, fan_out), jnp.float32, -bound, bound)
    b = jax.random.uniform(kb, (1, fan_out), jnp.float32, -bound, bound)
    return w, b


def _block_diag(a, b):
    r1, c1 = a.shape
    r2, c2 = b.shape
    top = jnp.concatenate([a, jnp.zeros((r1, c2), a.dtype)], axis=1)
    bot = jnp.concatenate([jnp.zeros((r2, c1), b.dtype), b], axis=1)
    return jnp.concatenate([top, bot], axis=0)


class ParameterGeneratorPallas:
    def __init__(self, memory_size, input_dim, output_dim, num_nodes, dynamic, key):
        self.memory_size = memory_size
        self.input_dim = input_dim
        self.output_dim = output_dim
        self.num_nodes = num_nodes
        self.dynamic = dynamic
        if dynamic:
            keys = jax.random.split(key, 6)
            # weight_generator: memory_size -> 32 -> 5 -> input_dim*output_dim
            w1, b1 = _init_linear(keys[0], memory_size, 32)
            w2, b2 = _init_linear(keys[1], 32, 5)
            w3, b3 = _init_linear(keys[2], 5, input_dim * output_dim)
            # bias_generator: memory_size -> 32 -> 5 -> output_dim
            v1, c1 = _init_linear(keys[3], memory_size, 32)
            v2, c2 = _init_linear(keys[4], 32, 5)
            v3, c3 = _init_linear(keys[5], 5, output_dim)
            self.wgen_params = (w1, b1, w2, b2, w3, b3)   # kept for reference/debug
            self.bgen_params = (v1, c1, v2, c2, v3, c3)

            d_w = input_dim * output_dim
            d_b = output_dim
            self.d_w, self.d_b = d_w, d_b

            # Layer 1: concat the two generators -> (M, 64). Stored bf16
            # (MXU-native; halves resident-weight bytes; numerics checked below).
            W1 = jnp.concatenate([w1, v1], axis=1).astype(jnp.bfloat16)     # (M, 64)
            B1 = jnp.concatenate([b1, c1], axis=1)                          # (1, 64)
            # Layer 2: block-diagonal (64, 10) zero-padded to (64, 128) so h2
            # stays lane-dense.
            W2 = jnp.pad(_block_diag(w2, v2), ((0, 0), (0, H2_PAD - 10)))   # (64, 128)
            B2 = jnp.pad(jnp.concatenate([b2, c2], axis=1),
                         ((0, 0), (0, H2_PAD - 10)))                        # (1, 128)
            # Layer 3: two heads reading padded h2. Columns 0:5 of h2 are the
            # weight-generator hidden, 5:10 the bias-generator hidden.
            W3w = jnp.zeros((H2_PAD, d_w), jnp.float32).at[0:5].set(w3)     # (128, d_w)
            W3b = jnp.zeros((H2_PAD, d_b), jnp.float32).at[5:10].set(v3)    # (128, d_b)
            self.fused_params = (W1, B1, W2, B2, W3w, b3, W3b, c3)
        else:
            # Static path: forward returns raw parameters, no compute to kernelize.
            # TODO(synk): torch.rand init on the raw-parameter path not matched exactly.
            kw, kb = jax.random.split(key)
            self.weights = jax.random.uniform(kw, (input_dim, output_dim), jnp.float32)
            self.biases = jax.random.uniform(kb, (input_dim,), jnp.float32)

    def __call__(self, x, memory=None):
        if not self.dynamic:
            return self.weights, self.biases

        B = x.shape[0]
        mem2d = memory.reshape(-1, self.memory_size)   # native dtype, no pre-cast
        R = mem2d.shape[0]
        assert R == B * self.num_nodes, (
            f"memory rows ({R}) != batch*num_nodes ({B * self.num_nodes})")

        tr = _choose_row_tile(R, self.memory_size, self.d_w, self.d_b)
        w_flat, b_flat = _run_fused(mem2d, self.fused_params, self.d_w, self.d_b, tr)
        weights = w_flat.reshape(B, self.num_nodes, self.input_dim, self.output_dim)
        biases = b_flat.reshape(B, self.num_nodes, self.output_dim)
        return weights, biases


# ---------------------------------------------------------------------------
# Pure-JAX reference (mirrors the kernel's bf16 layer-1 operands, f32 elsewhere)
# ---------------------------------------------------------------------------
def _ref_mlp3(mem2d, params):
    w1, b1, w2, b2, w3, b3 = params
    hp = jax.lax.Precision.HIGHEST
    x = mem2d.astype(jnp.bfloat16).astype(jnp.float32)
    w1b = w1.astype(jnp.bfloat16).astype(jnp.float32)
    h1 = jnp.maximum(jnp.dot(x, w1b, precision=hp) + b1, 0.0)
    h2 = jnp.maximum(jnp.dot(h1, w2, precision=hp) + b2, 0.0)
    return jnp.dot(h2, w3, precision=hp) + b3


if __name__ == "__main__":
    key = jax.random.PRNGKey(0)
    k_params, k_mem, k_x = jax.random.split(key, 3)

    # Small, consistent shapes.
    batch = 2
    num_nodes = 6
    memory_size = 32
    input_dim = 4
    output_dim = 8
    spatial = 16  # x only contributes x.shape[0]

    model = ParameterGeneratorPallas(
        memory_size, input_dim, output_dim, num_nodes, dynamic=True, key=k_params
    )

    x = jax.random.normal(k_x, (batch, input_dim, num_nodes, spatial), jnp.float32)
    memory = jax.random.normal(k_mem, (batch, num_nodes, memory_size), jnp.float32)

    weights, biases = model(x, memory)
    weights = jax.block_until_ready(weights)
    biases = jax.block_until_ready(biases)

    assert weights.shape == (batch, num_nodes, input_dim, output_dim), weights.shape
    assert biases.shape == (batch, num_nodes, output_dim), biases.shape

    # Pure-JAX reference check (same bf16 cast on the layer-1 operands).
    mem2d = memory.reshape(-1, memory_size)
    w_ref = _ref_mlp3(mem2d, model.wgen_params).reshape(
        batch, num_nodes, input_dim, output_dim
    )
    b_ref = _ref_mlp3(mem2d, model.bgen_params).reshape(batch, num_nodes, output_dim)
    assert jnp.allclose(weights, w_ref, atol=1e-3, rtol=1e-3), (
        float(jnp.max(jnp.abs(weights - w_ref))))
    assert jnp.allclose(biases, b_ref, atol=1e-3, rtol=1e-3), (
        float(jnp.max(jnp.abs(biases - b_ref))))

    print("KERNEL_OK")
</pallas_src>

<mosaic_0001>
module attributes {stable_mosaic.version = 11 : i64} {
  func.func @_fused_mlp_kernel(%arg0: i32, %arg1: memref<16x32xf32, #tpu.memory_space<vmem>>, %arg2: memref<32x64xbf16, #tpu.memory_space<vmem>>, %arg3: memref<1x64xf32, #tpu.memory_space<vmem>>, %arg4: memref<64x128xf32, #tpu.memory_space<vmem>>, %arg5: memref<1x128xf32, #tpu.memory_space<vmem>>, %arg6: memref<128x32xf32, #tpu.memory_space<vmem>>, %arg7: memref<1x32xf32, #tpu.memory_space<vmem>>, %arg8: memref<128x8xf32, #tpu.memory_space<vmem>>, %arg9: memref<1x8xf32, #tpu.memory_space<vmem>>, %arg10: memref<16x32xf32, #tpu.memory_space<vmem>>, %arg11: memref<16x8xf32, #tpu.memory_space<vmem>>) attributes {dimension_semantics = [#tpu.dimension_semantics<parallel>], iteration_bounds = array<i64: 1>, scalar_prefetch = 0 : i64, scratch_operands = 0 : i64, tpu.core_type = #tpu.core_type<tc>, window_params = [{transform_indices = @transform_0, window_bounds = array<i64: 16, 32>}, {pipeline_mode = #tpu.pipeline_mode<synchronous>, transform_indices = @transform_1, window_bounds = array<i64: 32, 64>}, {pipeline_mode = #tpu.pipeline_mode<synchronous>, transform_indices = @transform_2, window_bounds = array<i64: 1, 64>}, {pipeline_mode = #tpu.pipeline_mode<synchronous>, transform_indices = @transform_3, window_bounds = array<i64: 64, 128>}, {pipeline_mode = #tpu.pipeline_mode<synchronous>, transform_indices = @transform_4, window_bounds = array<i64: 1, 128>}, {pipeline_mode = #tpu.pipeline_mode<synchronous>, transform_indices = @transform_5, window_bounds = array<i64: 128, 32>}, {pipeline_mode = #tpu.pipeline_mode<synchronous>, transform_indices = @transform_6, window_bounds = array<i64: 1, 32>}, {pipeline_mode = #tpu.pipeline_mode<synchronous>, transform_indices = @transform_7, window_bounds = array<i64: 128, 8>}, {pipeline_mode = #tpu.pipeline_mode<synchronous>, transform_indices = @transform_8, window_bounds = array<i64: 1, 8>}, {transform_indices = @transform_9, window_bounds = array<i64: 16, 32>}, {transform_indices = @transform_10, window_bounds = array<i64: 16, 8>}]} {
    %c0 = arith.constant 0 : index
    %c0_0 = arith.constant 0 : index
    %0 = vector.load %arg1[%c0, %c0_0] : memref<16x32xf32, #tpu.memory_space<vmem>>, vector<16x32xf32>
    %1 = arith.truncf %0 : vector<16x32xf32> to vector<16x32xbf16>
    %c0_1 = arith.constant 0 : index
    %c0_2 = arith.constant 0 : index
    %2 = vector.load %arg2[%c0_1, %c0_2] : memref<32x64xbf16, #tpu.memory_space<vmem>>, vector<32x64xbf16>
    %cst = arith.constant dense<0.000000e+00> : vector<16x64xf32>
    %3 = tpu.matmul %1, %2, %cst {dimension_numbers = #tpu.dot_dimension_numbers<[1], [0], [0], [1], [0, 0, 1, 1], [], []>} : vector<16x32xbf16>, vector<32x64xbf16>, vector<16x64xf32> -> vector<16x64xf32>
    %c0_3 = arith.constant 0 : index
    %c0_4 = arith.constant 0 : index
    %4 = vector.load %arg3[%c0_3, %c0_4] : memref<1x64xf32, #tpu.memory_space<vmem>>, vector<1x64xf32>
    %5 = vector.broadcast %4 : vector<1x64xf32> to vector<16x64xf32>
    %6 = arith.addf %3, %5 : vector<16x64xf32>
    %cst_5 = arith.constant 0.000000e+00 : f32
    %7 = vector.broadcast %cst_5 : f32 to vector<16x64xf32>
    %8 = arith.maximumf %6, %7 : vector<16x64xf32>
    %c0_6 = arith.constant 0 : index
    %c0_7 = arith.constant 0 : index
    %9 = vector.load %arg4[%c0_6, %c0_7] : memref<64x128xf32, #tpu.memory_space<vmem>>, vector<64x128xf32>
    %cst_8 = arith.constant dense<0.000000e+00> : vector<16x128xf32>
    %10 = tpu.matmul %8, %9, %cst_8 {dimension_numbers = #tpu.dot_dimension_numbers<[1], [0], [0], [1], [0, 0, 1, 1], [], []>} : vector<16x64xf32>, vector<64x128xf32>, vector<16x128xf32> -> vector<16x128xf32>
    %c0_9 = arith.constant 0 : index
    %c0_10 = arith.constant 0 : index
    %11 = vector.load %arg5[%c0_9, %c0_10] : memref<1x128xf32, #tpu.memory_space<vmem>>, vector<1x128xf32>
    %12 = vector.broadcast %11 : vector<1x128xf32> to vector<16x128xf32>
    %13 = arith.addf %10, %12 : vector<16x128xf32>
    %cst_11 = arith.constant 0.000000e+00 : f32
    %14 = vector.broadcast %cst_11 : f32 to vector<16x128xf32>
    %15 = arith.maximumf %13, %14 : vector<16x128xf32>
    %c0_12 = arith.constant 0 : index
    %c0_13 = arith.constant 0 : index
    %16 = vector.load %arg6[%c0_12, %c0_13] : memref<128x32xf32, #tpu.memory_space<vmem>>, vector<128x32xf32>
    %cst_14 = arith.constant dense<0.000000e+00> : vector<16x32xf32>
    %17 = tpu.matmul %15, %16, %cst_14 {dimension_numbers = #tpu.dot_dimension_numbers<[1], [0], [0], [1], [0, 0, 1, 1], [], []>} : vector<16x128xf32>, vector<128x32xf32>, vector<16x32xf32> -> vector<16x32xf32>
    %c0_15 = arith.constant 0 : index
    %c0_16 = arith.constant 0 : index
    %18 = vector.load %arg7[%c0_15, %c0_16] : memref<1x32xf32, #tpu.memory_space<vmem>>, vector<1x32xf32>
    %19 = vector.broadcast %18 : vector<1x32xf32> to vector<16x32xf32>
    %20 = arith.addf %17, %19 : vector<16x32xf32>
    %c0_17 = arith.constant 0 : index
    %c0_18 = arith.constant 0 : index
    %21 = vector.load %arg8[%c0_17, %c0_18] : memref<128x8xf32, #tpu.memory_space<vmem>>, vector<128x8xf32>
    %cst_19 = arith.constant dense<0.000000e+00> : vector<16x8xf32>
    %22 = tpu.matmul %15, %21, %cst_19 {dimension_numbers = #tpu.dot_dimension_numbers<[1], [0], [0], [1], [0, 0, 1, 1], [], []>} : vector<16x128xf32>, vector<128x8xf32>, vector<16x8xf32> -> vector<16x8xf32>
    %c0_20 = arith.constant 0 : index
    %c0_21 = arith.constant 0 : index
    %23 = vector.load %arg9[%c0_20, %c0_21] : memref<1x8xf32, #tpu.memory_space<vmem>>, vector<1x8xf32>
    %24 = vector.broadcast %23 : vector<1x8xf32> to vector<16x8xf32>
    %25 = arith.addf %22, %24 : vector<16x8xf32>
    %c0_22 = arith.constant 0 : index
    %c0_23 = arith.constant 0 : index
    %26 = vector.load %arg10[%c0_22, %c0_23] : memref<16x32xf32, #tpu.memory_space<vmem>>, vector<16x32xf32>
    tpu.vector_store %arg10[%c0_22, %c0_23], %20 {strides = array<i32>} : memref<16x32xf32, #tpu.memory_space<vmem>>, vector<16x32xf32>,
    %c0_24 = arith.constant 0 : index
    %c0_25 = arith.constant 0 : index
    %27 = vector.load %arg11[%c0_24, %c0_25] : memref<16x8xf32, #tpu.memory_space<vmem>>, vector<16x8xf32>
    tpu.vector_store %arg11[%c0_24, %c0_25], %25 {strides = array<i32>} : memref<16x8xf32, #tpu.memory_space<vmem>>, vector<16x8xf32>,
    return
  }
  func.func @transform_0(%arg0: i32) -> (i32, i32) {
    %c0_i32 = arith.constant 0 : i32
    %c0_i32_0 = arith.constant 0 : i32
    return %arg0, %c0_i32 : i32, i32
  }
  func.func @transform_1(%arg0: i32) -> (i32, i32) {
    %c0_i32 = arith.constant 0 : i32
    %c0_i32_0 = arith.constant 0 : i32
    %c0_i32_1 = arith.constant 0 : i32
    return %c0_i32, %c0_i32_0 : i32, i32
  }
  func.func @transform_2(%arg0: i32) -> (i32, i32) {
    %c0_i32 = arith.constant 0 : i32
    %c0_i32_0 = arith.constant 0 : i32
    %c0_i32_1 = arith.constant 0 : i32
    return %c0_i32, %c0_i32_0 : i32, i32
  }
  func.func @transform_3(%arg0: i32) -> (i32, i32) {
    %c0_i32 = arith.constant 0 : i32
    %c0_i32_0 = arith.constant 0 : i32
    %c0_i32_1 = arith.constant 0 : i32
    return %c0_i32, %c0_i32_0 : i32, i32
  }
  func.func @transform_4(%arg0: i32) -> (i32, i32) {
    %c0_i32 = arith.constant 0 : i32
    %c0_i32_0 = arith.constant 0 : i32
    %c0_i32_1 = arith.constant 0 : i32
    return %c0_i32, %c0_i32_0 : i32, i32
  }
  func.func @transform_5(%arg0: i32) -> (i32, i32) {
    %c0_i32 = arith.constant 0 : i32
    %c0_i32_0 = arith.constant 0 : i32
    %c0_i32_1 = arith.constant 0 : i32
    return %c0_i32, %c0_i32_0 : i32, i32
  }
  func.func @transform_6(%arg0: i32) -> (i32, i32) {
    %c0_i32 = arith.constant 0 : i32
    %c0_i32_0 = arith.constant 0 : i32
    %c0_i32_1 = arith.constant 0 : i32
    return %c0_i32, %c0_i32_0 : i32, i32
  }
  func.func @transform_7(%arg0: i32) -> (i32, i32) {
    %c0_i32 = arith.constant 0 : i32
    %c0_i32_0 = arith.constant 0 : i32
    %c0_i32_1 = arith.constant 0 : i32
    return %c0_i32, %c0_i32_0 : i32, i32
  }
  func.func @transform_8(%arg0: i32) -> (i32, i32) {
    %c0_i32 = arith.constant 0 : i32
    %c0_i32_0 = arith.constant 0 : i32
    %c0_i32_1 = arith.constant 0 : i32
    return %c0_i32, %c0_i32_0 : i32, i32
  }
  func.func @transform_9(%arg0: i32) -> (i32, i32) {
    %c0_i32 = arith.constant 0 : i32
    %c0_i32_0 = arith.constant 0 : i32
    return %arg0, %c0_i32 : i32, i32
  }
  func.func @transform_10(%arg0: i32) -> (i32, i32) {
    %c0_i32 = arith.constant 0 : i32
    %c0_i32_0 = arith.constant 0 : i32
    return %arg0, %c0_i32 : i32, i32
  }
}

</mosaic_0001>

<bundles_post_ra>
// kernel: tpu_custom_call.1
= control target key start
LH: loop header
LB: loop body
LE: loop exit
PB: predicated region body
PF: predicated region fallthrough
CT: control target
= control target key end

     0   :  { %v613_v1 = vmov 0.0   ;;  %vm614_vm0 = vmmov 0   ;;  %s829_s0 = inlined_call_operand.vmem [shape: f32[12,32], index: 0, kind: input, shape index: {}]   ;;  %s830_s1 = inlined_call_operand.vmem [shape: bf16[32,64], index: 1, kind: input, shape index: {}]   ;;  %s831_s2 = inlined_call_operand.vmem [shape: f32[1,64], index: 2, kind: input, shape index: {}]   ;;  %s832_s3 = inlined_call_operand.vmem [shape: f32[64,128], index: 3, kind: input, shape index: {}]   ;;  %s833_s4 = inlined_call_operand.vmem [shape: f32[1,128], index: 4, kind: input, shape index: {}]   ;;  %s834_s5 = inlined_call_operand.vmem [shape: f32[128,32], index: 5, kind: input, shape index: {}]   ;;  %s835_s6 = inlined_call_operand.vmem [shape: f32[1,32], index: 6, kind: input, shape index: {}]   ;;  %s836_s7 = inlined_call_operand.vmem [shape: f32[128,8], index: 7, kind: input, shape index: {}]   ;;  %s837_s8 = inlined_call_operand.vmem [shape: f32[1,8], index: 8, kind: input, shape index: {}]   ;;  %s838_s9 = inlined_call_operand.hbm [shape: f32[12,32], index: 9, kind: output, shape index: {0}]   ;;  %s839_s10 = inlined_call_operand.vmem [shape: f32[12,8], index: 10, kind: output, shape index: {1}]  }
   0x1   :  { %v589_v0 = vld [vmem:[%s830_s1 + $0x8] sm:$0xff]   ;;  %487 = vmatprep.subr.bf16.mxu0 %v613_v1  ;;  %v590_v2 = vld [vmem:[%s830_s1] sm:$0xff]   ;;  %491 = vmatprep.mubr.msk.bf16.mxu0 %vm614_vm0, %v613_v1  ;;  %v116_v5 = vld [vmem:[%s832_s3 + $0x38] sm:$0xff] }
   0x2   :  { %488 = vmatpush3.bf16.msra.mxu0 %v589_v0  ;;  %v36_v3 = vld [vmem:[%s829_s0] sm:$0xff]  ;;  %v37_v4 = vld [vmem:[%s829_s0 + $0x8] sm:$0xff]  ;;  %495 = vmatprep.subr.mxu1 %v116_v5  ;;  %v115_v6 = vld [vmem:[%s832_s3 + $0x30] sm:$0xff] }
   0x3   :  { %489 = vmatprep.subr.bf16.mxu0 %v613_v1  ;;  %496 = vmatpush3.msra.mxu1 %v116_v5  ;;  %v114_v7 = vld [vmem:[%s832_s3 + $0x28] sm:$0xff] }
   0x4   :  { %16 = vsyncpa [#allocation3], 0  ;;  %v38_v8 = vpack.c.bf16 %v37_v4, %v36_v3  ;;  %497 = vmatprep.subr.mxu1 %v115_v6  ;;  %vm62_vm1 = vcmask 261120   ;;  %v113_v9 = vld [vmem:[%s832_s3 + $0x20] sm:$0xff]  ;;  %v112_v10 = vld [vmem:[%s832_s3 + $0x18] sm:$0xff]  ;;  %vm124_vm2 = vcmask 523264  }
   0x5   :  { %498 = vmatpush3.msra.mxu1 %v115_v6  ;;  %v111_v11 = vld [vmem:[%s832_s3 + $0x10] sm:$0xff]  ;;  %v110_v12 = vld [vmem:[%s832_s3 + $0x8] sm:$0xff]  ;;  %v109_v13 = vld [vmem:[%s832_s3] sm:$0xff]  ;;  %s615_s14 = smov [#allocation2]   ;;  %vm406_vm3 = vcmask 64512  }
   0x6   :  { %490 = vmatpush3.bf16.msra.mxu0 %v590_v2  ;;  %499 = vmatprep.subr.mxu1 %v114_v7  ;;  %v223_v14 = vld [vmem:[%s834_s5 + $0x78] sm:$0xff]  ;;  %v222_v16 = vld [vmem:[%s834_s5 + $0x70] sm:$0xff]  ;;  %v221_v17 = vld [vmem:[%s834_s5 + $0x68] sm:$0xff] }
   0x7   :  { %500 = vmatpush3.msra.mxu1 %v114_v7  ;;  %v321_v15 = vld [vmem:[%s836_s7 + $0x78] sm:$0xff]  ;;  %514 = vmatprep.subr.mxu0 %v223_v14  ;;  %v220_v18 = vld [vmem:[%s834_s5 + $0x60] sm:$0xff]  ;;  %v218_v20 = vld [vmem:[%s834_s5 + $0x50] sm:$0xff] }
   0x8   :  { %501 = vmatprep.subr.mxu1 %v113_v9  ;;  %v219_v19 = vld [vmem:[%s834_s5 + $0x58] sm:$0xff]  ;;  %v217_v21 = vld [vmem:[%s834_s5 + $0x48] sm:$0xff]  ;;  %v216_v22 = vld [vmem:[%s834_s5 + $0x40] sm:$0xff] }
   0x9   :  { %492 = vmatmul.mubr.msk.bf16.vlgmr.msra.gmra.mxu0 %vm62_vm1, %v38_v8  ;;  %502 = vmatpush3.msra.mxu1 %v113_v9  ;;  %v215_v23 = vld [vmem:[%s834_s5 + $0x38] sm:$0xff]  ;;  %v214_v24 = vld [vmem:[%s834_s5 + $0x30] sm:$0xff]  ;;  %v213_v25 = vld [vmem:[%s834_s5 + $0x28] sm:$0xff] }
   0xa   :  { %503 = vmatprep.subr.mxu1 %v112_v10  ;;  %515 = vmatpush3.msra.mxu0 %v223_v14  ;;  %v212_v26 = vld [vmem:[%s834_s5 + $0x20] sm:$0xff]  ;;  %v320_v36 = vld [vmem:[%s836_s7 + $0x70] sm:$0xff]  ;;  %v319_v37 = vld [vmem:[%s836_s7 + $0x68] sm:$0xff] }
   0xb   :  { %504 = vmatpush3.msra.mxu1 %v112_v10  ;;  %516 = vmatprep.subr.mxu0 %v222_v16  ;;  %v429_v27 = vld [vmem:[%s831_s2] ss:$0 sm:$0xff]  ;;  %v317_v39 = vld [vmem:[%s836_s7 + $0x58] sm:$0xff]  ;;  %v316_v40 = vld [vmem:[%s836_s7 + $0x50] sm:$0xff] }
   0xc   :  { %505 = vmatprep.subr.mxu1 %v111_v11  ;;  %517 = vmatpush3.msra.mxu0 %v222_v16  ;;  %v318_v38 = vld [vmem:[%s836_s7 + $0x60] sm:$0xff]  ;;  %v315_v41 = vld [vmem:[%s836_s7 + $0x48] sm:$0xff]  ;;  %v313_v43 = vld [vmem:[%s836_s7 + $0x38] sm:$0xff] }
   0xd   :  { %506 = vmatpush3.msra.mxu1 %v111_v11  ;;  %518 = vmatprep.subr.mxu0 %v221_v17  ;;  %v314_v42 = vld [vmem:[%s836_s7 + $0x40] sm:$0xff]  ;;  %v312_v44 = vld [vmem:[%s836_s7 + $0x30] sm:$0xff]  ;;  %v311_v45 = vld [vmem:[%s836_s7 + $0x28] sm:$0xff] }
   0xe   :  { %507 = vmatprep.subr.mxu1 %v110_v12  ;;  %519 = vmatpush3.msra.mxu0 %v221_v17  ;;  %v310_v46 = vld [vmem:[%s836_s7 + $0x20] sm:$0xff]  ;;  %v211_v47 = vld [vmem:[%s834_s5 + $0x18] sm:$0xff]  ;;  %v210_v49 = vld [vmem:[%s834_s5 + $0x10] sm:$0xff] }
   0xf   :  { %508 = vmatpush3.msra.mxu1 %v110_v12  ;;  %520 = vmatprep.subr.mxu0 %v220_v18  ;;  %v309_v48 = vld [vmem:[%s836_s7 + $0x18] sm:$0xff]  ;;  %v308_v50 = vld [vmem:[%s836_s7 + $0x10] sm:$0xff]  ;;  %v209_v51 = vld [vmem:[%s834_s5 + $0x8] sm:$0xff] }
  0x10   :  { %509 = vmatprep.subr.mxu1 %v109_v13  ;;  %521 = vmatpush3.msra.mxu0 %v220_v18  ;;  %v307_v52 = vld [vmem:[%s836_s7 + $0x8] sm:$0xff]  ;;  %v208_v53 = vld [vmem:[%s834_s5] sm:$0xff] }
  0x11   :  { %510 = vmatpush3.msra.mxu1 %v109_v13  ;;  %522 = vmatprep.subr.mxu0 %v219_v19  ;;  %v306_v54 = vld [vmem:[%s836_s7] sm:$0xff] }
  0x12   :  { %549 = vmatprep.subr.mxu1 %v321_v15  ;;  %523 = vmatpush3.msra.mxu0 %v219_v19  ;;  %v433_v55 = vld [vmem:[%s833_s4] ss:$0 sm:$0xff]  ;;  %s414_s4 = sshll.u32 %s615_s14, 4  ;;  %s415_s4 = int_to_ptr.vmem [resolvable:$true] %s414_s4 }
  0x13   :  { %524 = vmatprep.subr.mxu0 %v218_v20  ;;  %v436_v62 = vld [vmem:[%s835_s6] ss:$0 sm:$0xff]  ;;  %s591_s17 = scalar_lea.vmem %s415_s4, 256  ;;  %p596_p1 = scmp.lt.s32.totalorder %s415_s4, %s415_s4 }
  0x14   :  { %525 = vmatpush3.msra.mxu0 %v218_v20  ;;  %v437_v63 = vld [vmem:[%s837_s8] ss:$0 sm:$0xff]  ;;  %p592_p0 = scmp.ne.s32.totalorder %s415_s4, %s591_s17  ;;  %p597_p2 = scmp.lt.s32.totalorder %s591_s17, %s591_s17 }
  0x15   :  { %526 = vmatprep.subr.mxu0 %v217_v21 }
  0x16   :  { %527 = vmatpush3.msra.mxu0 %v217_v21  ;;  %p598_p3 = por %p597_p2, %p596_p1 }
  0x17   :  { %528 = vmatprep.subr.mxu0 %v216_v22 }
  0x18   :  { %529 = vmatpush3.msra.mxu0 %v216_v22  ;;  %p599_p4 = pnand %p598_p3, %p592_p0 }
  0x19   :  { %530 = vmatprep.subr.mxu0 %v215_v23 }
  0x1a   :  { %531 = vmatpush3.msra.mxu0 %v215_v23 }
  0x1b   :  { %532 = vmatprep.subr.mxu0 %v214_v24 }
  0x1c   :  { %533 = vmatpush3.msra.mxu0 %v214_v24 }
  0x1d   :  { %534 = vmatprep.subr.mxu0 %v213_v25 }
  0x1e   :  { %535 = vmatpush3.msra.mxu0 %v213_v25 }
  0x1f   :  { %536 = vmatprep.subr.mxu0 %v212_v26 }
  0x20   :  { %537 = vmatpush3.msra.mxu0 %v212_v26 }
  0x21   :  { %538 = vmatprep.subr.mxu0 %v211_v47 }
  0x22   :  { %539 = vmatpush3.msra.mxu0 %v211_v47 }
  0x23   :  { %540 = vmatprep.subr.mxu0 %v210_v49 }
  0x24   :  { %541 = vmatpush3.msra.mxu0 %v210_v49 }
  0x25   :  { %542 = vmatprep.subr.mxu0 %v209_v51 }
  0x26   :  { %543 = vmatpush3.msra.mxu0 %v209_v51 }
  0x27   :  { %544 = vmatprep.subr.mxu0 %v208_v53 }
  0x28   :  { %545 = vmatpush3.msra.mxu0 %v208_v53 }
  0xc9   :  { %v100_v28 = vpop.f32.mrf.mxu0 }
  0xca   :  { %v101_v29 = vadd.f32 %v429_v27, %v100_v28 }
  0xcb   :  { %v493_v30 = vpop.f32.mrf.mxu0 }
  0xcc   :  { %v107_v31 = vmax.f32 %v101_v29, 0.0 }
  0xcd   :  { %v103_v32 = vpop.f32.mrf.mxu0 }
  0xce   :  { %v104_v33 = vadd.f32 %v429_v27, %v103_v32  ;;  %511 = vmatprep.mubr.msk.f32.mxu1 %vm124_vm2, %v107_v31 }
  0xcf   :  { %v494_v34 = vpop.f32.mrf.mxu0 }
  0xd0   :  { %v108_v35 = vmax.f32 %v104_v33, 0.0 }
  0xd2   :  { %512 = vmatmul.mubr.msk.f32.vlgmr.msra.gmra.mxu1 %vm124_vm2, %v108_v35 }
  0xd3   :  { %550 = vmatpush3.msra.mxu1 %v321_v15 }
  0xd4   :  { %551 = vmatprep.subr.mxu1 %v320_v36 }
  0xd5   :  { %552 = vmatpush3.msra.mxu1 %v320_v36 }
  0xd6   :  { %553 = vmatprep.subr.mxu1 %v319_v37 }
  0xd7   :  { %554 = vmatpush3.msra.mxu1 %v319_v37 }
  0xd8   :  { %555 = vmatprep.subr.mxu1 %v318_v38 }
  0xd9   :  { %556 = vmatpush3.msra.mxu1 %v318_v38 }
  0xda   :  { %557 = vmatprep.subr.mxu1 %v317_v39 }
  0xdb   :  { %558 = vmatpush3.msra.mxu1 %v317_v39 }
  0xdc   :  { %559 = vmatprep.subr.mxu1 %v316_v40 }
  0xdd   :  { %560 = vmatpush3.msra.mxu1 %v316_v40 }
  0xde   :  { %561 = vmatprep.subr.mxu1 %v315_v41 }
  0xdf   :  { %562 = vmatpush3.msra.mxu1 %v315_v41 }
  0xe0   :  { %563 = vmatprep.subr.mxu1 %v314_v42 }
  0xe1   :  { %564 = vmatpush3.msra.mxu1 %v314_v42 }
  0xe2   :  { %565 = vmatprep.subr.mxu1 %v313_v43 }
  0xe3   :  { %566 = vmatpush3.msra.mxu1 %v313_v43 }
  0xe4   :  { %567 = vmatprep.subr.mxu1 %v312_v44 }
  0xe5   :  { %568 = vmatpush3.msra.mxu1 %v312_v44 }
  0xe6   :  { %569 = vmatprep.subr.mxu1 %v311_v45 }
  0xe7   :  { %570 = vmatpush3.msra.mxu1 %v311_v45 }
  0xe8   :  { %571 = vmatprep.subr.mxu1 %v310_v46 }
  0xe9   :  { %572 = vmatpush3.msra.mxu1 %v310_v46 }
  0xea   :  { %573 = vmatprep.subr.mxu1 %v309_v48 }
  0xeb   :  { %574 = vmatpush3.msra.mxu1 %v309_v48 }
  0xec   :  { %575 = vmatprep.subr.mxu1 %v308_v50 }
  0xed   :  { %576 = vmatpush3.msra.mxu1 %v308_v50 }
  0xee   :  { %577 = vmatprep.subr.mxu1 %v307_v52 }
  0xef   :  { %578 = vmatpush3.msra.mxu1 %v307_v52 }
  0xf0   :  { %579 = vmatprep.subr.mxu1 %v306_v54 }
  0xf1   :  { %580 = vmatpush3.msra.mxu1 %v306_v54 }
 0x192   :  { %v513_v56 = vpop.f32.mrf.mxu1 }
 0x193   :  { %v203_v57 = vadd.f32 %v513_v56, %v433_v55 }
 0x194   :  { %v197_v58 = vpop.f32.mrf.mxu1 }
 0x195   :  { %v198_v59 = vadd.f32 %v433_v55, %v197_v58  ;;  %v207_v61 = vmax.f32 %v203_v57, 0.0 }
 0x197   :  { %v206_v60 = vmax.f32 %v198_v59, 0.0 }
 0x199   :  { %546 = vmatprep.mubr.f32.mxu0 %v206_v60  ;;  %581 = vmatprep.mubr.f32.mxu1 %v206_v60 }
 0x19a   :  { %547 = vmatmul.mubr.f32.vlgmr.msra.gmra.mxu0 %v207_v61  ;;  %582 = vmatmul.mubr.f32.vlgmr.msra.gmra.mxu1 %v207_v61 }
 0x25a   :  { %v548_v0 = vpop.f32.mrf.mxu0  ;;  %v583_v1 = vpop.f32.mrf.mxu1 }
 0x25b   :  { %v303_v2 = vadd.f32 %v548_v0, %v436_v62  ;;  %v401_v3 = vadd.f32 %v583_v1, %v437_v63 }
 0x25c   :  { %v297_v4 = vpop.f32.mrf.mxu0  ;;  %v395_v5 = vpop.f32.mrf.mxu1 }
 0x25d   :  { %405 = vst.msk [vmem:[#allocation2 + $0x8] sm:$0xff] %vm62_vm1, %v303_v2  ;;  %v298_v6 = vadd.f32 %v436_v62, %v297_v4  ;;  %v396_v7 = vadd.f32 %v437_v63, %v395_v5 }
 0x25e   :  { %408 = vst.msk [vmem:[%s839_s10 + $0x8] sm:$0xff] %vm406_vm3, %v401_v3 }
 0x25f   :  { %404 = vst.msk [vmem:[#allocation2] sm:$0xff] %vm62_vm1, %v298_v6 }
 0x260   :  { %407 = vst.msk [vmem:[%s839_s10] sm:$0xff] %vm406_vm3, %v396_v7 }
 0x261   :  { %602 = shalt.err (!%p599_p4)
}
 0x262   :  { %s616_s18 = smov 128   ;;  %s617_s19 = smov 8  }
 0x263   :  { %420 = dma.vmem_to_hbm [thread:$0]  %s415_s4, 256, %s838_s9, [#allocation3], %s616_s18, %s616_s18, %s617_s19  }
 0x264   :  { %611 = dma.done.wait [#allocation3], 256  }
 0x265   :  { %612 = vsyncadd [#allocation3], 4294967040 }
 0x266   :  { %428 = vsyncpa [#allocation3], 1 }

</bundles_post_ra>
